<compile_context>
chip_gen: v7x
topology: tpu7x:2x2x1
jax: 0.10.0
libtpu: 0.0.40
codegen_flags: <defaults>
</compile_context>

<pallas_src>
import jax
import jax.numpy as jnp
from jax.experimental import pallas as pl
from jax.experimental.pallas import tpu as pltpu


# ----------------------------------------------------------------------------
# Kernel
# ----------------------------------------------------------------------------
def _head_kernel(obj_ref,                               # scalar prefetch (SMEM)
                 x_ref, w1_ref, b1_ref, w2_ref, b2_ref, wh_ref, bh_ref,
                 t_ref, r_ref):
    cdt = w1_ref.dtype                                  # compute dtype (bf16/f32)
    bb = x_ref.shape[0]                                 # batch elems per grid step
    base = pl.program_id(0) * bb                        # global batch offset

    def lrelu(v):                                       # LeakyReLU(0.1)
        return jnp.maximum(v, 0.1 * v)

    # Static (fully unrolled, bb <= 8) loop over this step's batch elements.
    # Each iteration: three small MXU matmuls, hidden under the next x DMA.
    for lb in range(bb):
        x = x_ref[lb].astype(cdt)                       # cast AFTER the DMA, in VMEM

        # fc1: Conv1d(k=1) == matmul (+bias, +LeakyReLU), f32 accumulation.
        v1 = jnp.dot(w1_ref[...], x, preferred_element_type=jnp.float32) + b1_ref[...]
        h1 = lrelu(v1).astype(cdt)                      # (64, tn)

        # fc2
        v2 = jnp.dot(w2_ref[...], h1, preferred_element_type=jnp.float32) + b2_ref[...]
        h2 = lrelu(v2).astype(cdt)                      # (64, tn)

        # fused fc_trans + fc_rot head; per-element object row selected here
        # from the resident head table (rows 0:3 = trans, 3:7 = rot, 7 = pad).
        ob = obj_ref[base + lb]
        out = jnp.dot(wh_ref[ob], h2, preferred_element_type=jnp.float32) + bh_ref[ob]
        t_ref[lb] = out[0:3].astype(t_ref.dtype)
        r_ref[lb] = out[3:7].astype(r_ref.dtype)


# ----------------------------------------------------------------------------
# Tiling plan (generation-aware)
# ----------------------------------------------------------------------------
def _round_up(v, m):
    return ((v + m - 1) // m) * m


def _largest_div128(n, cap):
    """Largest multiple-of-128 divisor of n that is <= cap (0 if none)."""
    t = (cap // 128) * 128
    while t >= 128:
        if n % t == 0:
            return t
        t -= 128
    return 0


def _plan_tiling(bs, feat, n, x_bytes, out_bytes, budget):
    """Return (Bb, tn, Np): batch elems per grid step, spatial tile width
    (multiple of 128) and padded spatial extent (multiple of tn)."""
    LANE = 128
    np128 = _round_up(n, LANE)

    def lane_bytes(bb):
        # double-buffered x tile + double-buffered t/r tiles + one live set of
        # intermediates (64 rows, ~16 B/lane) per lane of tile width.
        return bb * (feat * x_bytes * 2 + 8 * out_bytes * 2) + 64 * 16

    # Small spatial extent: keep the full (padded) N per step and block several
    # batch elements per grid step to amortize per-step overhead.
    if np128 <= 4096 and np128 * lane_bytes(1) <= budget:
        bb = 1
        for cand in range(min(bs, 8), 0, -1):
            if bs % cand == 0 and np128 * lane_bytes(cand) <= budget:
                bb = cand
                break
        return bb, np128, np128

    # Large spatial extent: one batch element per step; tn from the VMEM budget,
    # capped so the grid has >= 4 steps (feeds both v7x TensorCores).
    tn_vmem = max(LANE, (budget // lane_bytes(1)) // LANE * LANE)
    tiles_wanted = max(1, -(-4 // bs))                 # ceil(4 / bs)
    tn_steps = max(LANE, (np128 // tiles_wanted) // LANE * LANE)
    tn_cap = min(tn_vmem, tn_steps)
    tn = tn_cap
    if n % LANE == 0:                                  # avoid padding when possible
        tn = _largest_div128(n, tn_cap) or tn_cap
    return 1, tn, _round_up(n, tn)


# ----------------------------------------------------------------------------
# Wrapper
# ----------------------------------------------------------------------------
def prediction_head_conv(x, obj, params, num_obj, *, compute_dtype=jnp.bfloat16):
    """x: (bs, in_features, h, w); obj: (bs,) int32 in [0, num_obj)."""
    bs, feat, h, w = x.shape
    N = h * w
    out_dtype = x.dtype
    x_bytes = jnp.dtype(x.dtype).itemsize
    out_bytes = jnp.dtype(out_dtype).itemsize

    w1, b1, w2, b2, wt, bt, wr, br = params

    # Fused head table: (num_obj, 8, 64) / (num_obj, 8, 1);
    # rows 0:3 = trans, 3:7 = rot, row 7 = zero pad (sublane alignment).
    wt3 = wt.reshape(num_obj, 3, 64)
    wr4 = wr.reshape(num_obj, 4, 64)
    wh = jnp.concatenate([wt3, wr4, jnp.zeros((num_obj, 1, 64), wt.dtype)], axis=1)
    bh = jnp.concatenate([bt.reshape(num_obj, 3), br.reshape(num_obj, 4),
                          jnp.zeros((num_obj, 1), bt.dtype)], axis=1)[..., None]

    # Weights in compute dtype (tiny arrays); biases stay f32; x stays native.
    w1c = w1.astype(compute_dtype)
    w2c = w2.astype(compute_dtype)
    whc = wh.astype(compute_dtype)
    b1c = b1.reshape(64, 1).astype(jnp.float32)
    b2c = b2.reshape(64, 1).astype(jnp.float32)
    bhc = bh.astype(jnp.float32)

    # Generation-aware VMEM budget (v5e/v6e: 128 MiB physical -> 96 MiB scoped;
    # v7x: 64 MiB physical -> keep the 32 MiB scoped default).
    MIB = 1024 * 1024
    try:
        vmem_cap = pltpu.get_tpu_info().vmem_capacity_bytes
    except Exception:
        vmem_cap = 64 * MIB                            # conservative fallback
    vmem_limit = 96 * MIB if vmem_cap >= 128 * MIB else 32 * MIB
    budget = int(vmem_limit * 0.7)

    Bb, tn, Np = _plan_tiling(bs, feat, N, x_bytes, out_bytes, budget)

    # Free metadata reshape; pad the lane axis only when N is not 128-aligned.
    x_flat = x.reshape(bs, feat, N)
    if Np != N:
        x_flat = jnp.pad(x_flat, ((0, 0), (0, 0), (0, Np - N)))

    obj_i = jnp.clip(obj.astype(jnp.int32), 0, num_obj - 1)   # no OOB fetches

    grid = (bs // Bb, Np // tn)
    grid_spec = pltpu.PrefetchScalarGridSpec(
        num_scalar_prefetch=1,
        grid=grid,
        in_specs=[
            pl.BlockSpec((Bb, feat, tn), lambda bi, ni, obj: (bi, 0, ni)),   # x tile
            pl.BlockSpec((64, feat),     lambda bi, ni, obj: (0, 0)),        # w1 (resident)
            pl.BlockSpec((64, 1),        lambda bi, ni, obj: (0, 0)),        # b1
            pl.BlockSpec((64, 64),       lambda bi, ni, obj: (0, 0)),        # w2
            pl.BlockSpec((64, 1),        lambda bi, ni, obj: (0, 0)),        # b2
            pl.BlockSpec((num_obj, 8, 64), lambda bi, ni, obj: (0, 0, 0)),   # head W (resident)
            pl.BlockSpec((num_obj, 8, 1),  lambda bi, ni, obj: (0, 0, 0)),   # head b (resident)
        ],
        out_specs=[
            pl.BlockSpec((Bb, 3, tn), lambda bi, ni, obj: (bi, 0, ni)),      # t
            pl.BlockSpec((Bb, 4, tn), lambda bi, ni, obj: (bi, 0, ni)),      # r
        ],
    )

    t_out, r_out = pl.pallas_call(
        _head_kernel,
        out_shape=(jax.ShapeDtypeStruct((bs, 3, Np), out_dtype),
                   jax.ShapeDtypeStruct((bs, 4, Np), out_dtype)),
        grid_spec=grid_spec,
        compiler_params=pltpu.CompilerParams(
            dimension_semantics=("parallel", "parallel"),
            vmem_limit_bytes=vmem_limit),
    )(obj_i, x_flat, w1c, b1c, w2c, b2c, whc, bhc)

    if Np != N:
        t_out = t_out[:, :, :N]
        r_out = r_out[:, :, :N]
    return t_out.reshape(bs, 3, h, w), r_out.reshape(bs, 4, h, w)


# ----------------------------------------------------------------------------
# Pure-JAX reference + synthetic params
# ----------------------------------------------------------------------------
def _reference(x, obj, params, num_obj):
    """Pure-JAX f32 reference matching the PyTorch forward."""
    bs, feat, h, w = x.shape
    w1, b1, w2, b2, wt, bt, wr, br = params
    xf = x.reshape(bs, feat, h * w)

    def lrelu(v):
        return jnp.where(v > 0, v, 0.1 * v)

    h1 = lrelu(jnp.einsum('oc,bcn->bon', w1, xf) + b1[None, :, None])
    h2 = lrelu(jnp.einsum('oc,bcn->bon', w2, h1) + b2[None, :, None])
    t = (jnp.einsum('oc,bcn->bon', wt, h2) + bt[None, :, None]
         ).reshape(bs, num_obj, 3, h, w)
    r = (jnp.einsum('oc,bcn->bon', wr, h2) + br[None, :, None]
         ).reshape(bs, num_obj, 4, h, w)
    t_sel = jnp.take_along_axis(t, obj[:, None, None, None, None], axis=1)[:, 0]
    r_sel = jnp.take_along_axis(r, obj[:, None, None, None, None], axis=1)[:, 0]
    return t_sel, r_sel


def _init_params(key, num_obj, in_features):
    """Deterministic synthetic init (Conv1d k=1 weight shapes, bias=True)."""
    ks = jax.random.split(key, 8)

    def u(k, shape, fan_in):
        bound = 1.0 / jnp.sqrt(fan_in)
        return jax.random.uniform(k, shape, jnp.float32, -bound, bound)

    w1 = u(ks[0], (64, in_features), in_features)
    b1 = u(ks[1], (64,), in_features)
    w2 = u(ks[2], (64, 64), 64)
    b2 = u(ks[3], (64,), 64)
    wt = u(ks[4], (3 * num_obj, 64), 64)
    bt = u(ks[5], (3 * num_obj,), 64)
    wr = u(ks[6], (4 * num_obj, 64), 64)
    br = u(ks[7], (4 * num_obj,), 64)
    return (w1, b1, w2, b2, wt, bt, wr, br)


if __name__ == "__main__":
    key = jax.random.PRNGKey(0)
    kx, kp, ko, kx2, kp2, ko2 = jax.random.split(key, 6)

    # --- main config: module defaults (in_features=128), 16x16 feature map ---
    bs, in_features, h, w = 2, 128, 16, 16
    num_obj = 5
    x = jax.random.normal(kx, (bs, in_features, h, w), jnp.float32)
    obj = jax.random.randint(ko, (bs,), 0, num_obj, jnp.int32)
    params = _init_params(kp, num_obj, in_features)
    t_gold, r_gold = _reference(x, obj, params, num_obj)

    # Exact-semantics path (f32 MXU operands): tight check.
    t32, r32 = prediction_head_conv(x, obj, params, num_obj,
                                    compute_dtype=jnp.float32)
    jax.block_until_ready((t32, r32))
    assert t32.shape == (bs, 3, h, w) and r32.shape == (bs, 4, h, w)
    assert jnp.allclose(t32, t_gold, atol=1e-4, rtol=1e-4)
    assert jnp.allclose(r32, r_gold, atol=1e-4, rtol=1e-4)

    # Fast path (bf16 MXU operands, f32 accumulation): looser tolerance.
    t, r = prediction_head_conv(x, obj, params, num_obj)
    jax.block_until_ready((t, r))
    assert t.shape == (bs, 3, h, w) and r.shape == (bs, 4, h, w)
    assert jnp.allclose(t, t_gold, atol=5e-2, rtol=5e-2)
    assert jnp.allclose(r, r_gold, atol=5e-2, rtol=5e-2)

    # --- odd spatial size: exercises lane padding (N=50 -> 128) and Bb=3 ---
    bs2, h2, w2, num_obj2 = 3, 5, 10, 4
    x2 = jax.random.normal(kx2, (bs2, in_features, h2, w2), jnp.float32)
    obj2 = jax.random.randint(ko2, (bs2,), 0, num_obj2, jnp.int32)
    params2 = _init_params(kp2, num_obj2, in_features)
    t2_gold, r2_gold = _reference(x2, obj2, params2, num_obj2)
    t2, r2 = prediction_head_conv(x2, obj2, params2, num_obj2,
                                  compute_dtype=jnp.float32)
    jax.block_until_ready((t2, r2))
    assert t2.shape == (bs2, 3, h2, w2) and r2.shape == (bs2, 4, h2, w2)
    assert jnp.allclose(t2, t2_gold, atol=1e-4, rtol=1e-4)
    assert jnp.allclose(r2, r2_gold, atol=1e-4, rtol=1e-4)

    print("KERNEL_OK")
</pallas_src>

<mosaic_0001>
module attributes {stable_mosaic.version = 11 : i64} {
  func.func @_head_kernel(%arg0: i32, %arg1: i32, %arg2: memref<2xi32, #tpu.memory_space<smem>>, %arg3: memref<2x128x256xf32, #tpu.memory_space<vmem>>, %arg4: memref<64x128xf32, #tpu.memory_space<vmem>>, %arg5: memref<64x1xf32, #tpu.memory_space<vmem>>, %arg6: memref<64x64xf32, #tpu.memory_space<vmem>>, %arg7: memref<64x1xf32, #tpu.memory_space<vmem>>, %arg8: memref<5x8x64xf32, #tpu.memory_space<vmem>>, %arg9: memref<5x8x1xf32, #tpu.memory_space<vmem>>, %arg10: memref<2x3x256xf32, #tpu.memory_space<vmem>>, %arg11: memref<2x4x256xf32, #tpu.memory_space<vmem>>) attributes {dimension_semantics = [#tpu.dimension_semantics<parallel>, #tpu.dimension_semantics<parallel>], iteration_bounds = array<i64: 1, 1>, scalar_prefetch = 1 : i64, scratch_operands = 0 : i64, tpu.core_type = #tpu.core_type<tc>, window_params = [{transform_indices = @transform_0, window_bounds = array<i64: 2, 128, 256>}, {pipeline_mode = #tpu.pipeline_mode<synchronous>, transform_indices = @transform_1, window_bounds = array<i64: 64, 128>}, {pipeline_mode = #tpu.pipeline_mode<synchronous>, transform_indices = @transform_2, window_bounds = array<i64: 64, 1>}, {pipeline_mode = #tpu.pipeline_mode<synchronous>, transform_indices = @transform_3, window_bounds = array<i64: 64, 64>}, {pipeline_mode = #tpu.pipeline_mode<synchronous>, transform_indices = @transform_4, window_bounds = array<i64: 64, 1>}, {pipeline_mode = #tpu.pipeline_mode<synchronous>, transform_indices = @transform_5, window_bounds = array<i64: 5, 8, 64>}, {pipeline_mode = #tpu.pipeline_mode<synchronous>, transform_indices = @transform_6, window_bounds = array<i64: 5, 8, 1>}, {transform_indices = @transform_7, window_bounds = array<i64: 2, 3, 256>}, {transform_indices = @transform_8, window_bounds = array<i64: 2, 4, 256>}]} {
    %c2_i32 = arith.constant 2 : i32
    %0 = arith.muli %arg0, %c2_i32 : i32
    %c0 = arith.constant 0 : index
    %c0_0 = arith.constant 0 : index
    %c0_1 = arith.constant 0 : index
    %1 = vector.load %arg3[%c0, %c0_0, %c0_1] : memref<2x128x256xf32, #tpu.memory_space<vmem>>, vector<1x128x256xf32>
    %2 = vector.shape_cast %1 : vector<1x128x256xf32> to vector<128x256xf32>
    %c0_2 = arith.constant 0 : index
    %c0_3 = arith.constant 0 : index
    %3 = vector.load %arg4[%c0_2, %c0_3] : memref<64x128xf32, #tpu.memory_space<vmem>>, vector<64x128xf32>
    %cst = arith.constant dense<0.000000e+00> : vector<64x256xf32>
    %4 = tpu.matmul %3, %2, %cst {dimension_numbers = #tpu.dot_dimension_numbers<[1], [0], [0], [1], [0, 0, 1, 1], [], []>} : vector<64x128xf32>, vector<128x256xf32>, vector<64x256xf32> -> vector<64x256xf32>
    %c0_4 = arith.constant 0 : index
    %c0_5 = arith.constant 0 : index
    %5 = vector.load %arg5[%c0_4, %c0_5] : memref<64x1xf32, #tpu.memory_space<vmem>>, vector<64x1xf32>
    %6 = vector.broadcast %5 : vector<64x1xf32> to vector<64x256xf32>
    %7 = arith.addf %4, %6 : vector<64x256xf32>
    %cst_6 = arith.constant 1.000000e-01 : f32
    %8 = vector.broadcast %cst_6 : f32 to vector<64x256xf32>
    %9 = arith.mulf %8, %7 : vector<64x256xf32>
    %10 = arith.maximumf %7, %9 : vector<64x256xf32>
    %c0_7 = arith.constant 0 : index
    %c0_8 = arith.constant 0 : index
    %11 = vector.load %arg6[%c0_7, %c0_8] : memref<64x64xf32, #tpu.memory_space<vmem>>, vector<64x64xf32>
    %cst_9 = arith.constant dense<0.000000e+00> : vector<64x256xf32>
    %12 = tpu.matmul %11, %10, %cst_9 {dimension_numbers = #tpu.dot_dimension_numbers<[1], [0], [0], [1], [0, 0, 1, 1], [], []>} : vector<64x64xf32>, vector<64x256xf32>, vector<64x256xf32> -> vector<64x256xf32>
    %c0_10 = arith.constant 0 : index
    %c0_11 = arith.constant 0 : index
    %13 = vector.load %arg7[%c0_10, %c0_11] : memref<64x1xf32, #tpu.memory_space<vmem>>, vector<64x1xf32>
    %14 = vector.broadcast %13 : vector<64x1xf32> to vector<64x256xf32>
    %15 = arith.addf %12, %14 : vector<64x256xf32>
    %cst_12 = arith.constant 1.000000e-01 : f32
    %16 = vector.broadcast %cst_12 : f32 to vector<64x256xf32>
    %17 = arith.mulf %16, %15 : vector<64x256xf32>
    %18 = arith.maximumf %15, %17 : vector<64x256xf32>
    %c0_i32 = arith.constant 0 : i32
    %19 = arith.addi %0, %c0_i32 : i32
    %20 = arith.index_cast %19 : i32 to index
    %21 = memref.load %arg2[%20] : memref<2xi32, #tpu.memory_space<smem>>
    %22 = arith.index_cast %21 : i32 to index
    %c0_13 = arith.constant 0 : index
    %c0_14 = arith.constant 0 : index
    %23 = vector.load %arg8[%22, %c0_13, %c0_14] : memref<5x8x64xf32, #tpu.memory_space<vmem>>, vector<1x8x64xf32>
    %24 = vector.shape_cast %23 : vector<1x8x64xf32> to vector<8x64xf32>
    %cst_15 = arith.constant dense<0.000000e+00> : vector<8x256xf32>
    %25 = tpu.matmul %24, %18, %cst_15 {dimension_numbers = #tpu.dot_dimension_numbers<[1], [0], [0], [1], [0, 0, 1, 1], [], []>} : vector<8x64xf32>, vector<64x256xf32>, vector<8x256xf32> -> vector<8x256xf32>
    %26 = arith.index_cast %21 : i32 to index
    %c0_16 = arith.constant 0 : index
    %c0_17 = arith.constant 0 : index
    %27 = vector.load %arg9[%26, %c0_16, %c0_17] : memref<5x8x1xf32, #tpu.memory_space<vmem>>, vector<1x8x1xf32>
    %28 = vector.shape_cast %27 : vector<1x8x1xf32> to vector<8x1xf32>
    %29 = vector.broadcast %28 : vector<8x1xf32> to vector<8x256xf32>
    %30 = arith.addf %25, %29 : vector<8x256xf32>
    %31 = vector.extract_strided_slice %30 {offsets = [0, 0], sizes = [3, 256], strides = [1, 1]} : vector<8x256xf32> to vector<3x256xf32>
    %c0_18 = arith.constant 0 : index
    %c0_19 = arith.constant 0 : index
    %c0_20 = arith.constant 0 : index
    %32 = vector.load %arg10[%c0_18, %c0_19, %c0_20] : memref<2x3x256xf32, #tpu.memory_space<vmem>>, vector<1x3x256xf32>
    %33 = vector.shape_cast %32 : vector<1x3x256xf32> to vector<3x256xf32>
    %34 = vector.shape_cast %31 : vector<3x256xf32> to vector<1x3x256xf32>
    tpu.vector_store %arg10[%c0_18, %c0_19, %c0_20], %34 {strides = array<i32>} : memref<2x3x256xf32, #tpu.memory_space<vmem>>, vector<1x3x256xf32>,
    %35 = vector.extract_strided_slice %30 {offsets = [3, 0], sizes = [4, 256], strides = [1, 1]} : vector<8x256xf32> to vector<4x256xf32>
    %c0_21 = arith.constant 0 : index
    %c0_22 = arith.constant 0 : index
    %c0_23 = arith.constant 0 : index
    %36 = vector.load %arg11[%c0_21, %c0_22, %c0_23] : memref<2x4x256xf32, #tpu.memory_space<vmem>>, vector<1x4x256xf32>
    %37 = vector.shape_cast %36 : vector<1x4x256xf32> to vector<4x256xf32>
    %38 = vector.shape_cast %35 : vector<4x256xf32> to vector<1x4x256xf32>
    tpu.vector_store %arg11[%c0_21, %c0_22, %c0_23], %38 {strides = array<i32>} : memref<2x4x256xf32, #tpu.memory_space<vmem>>, vector<1x4x256xf32>,
    %c1 = arith.constant 1 : index
    %c0_24 = arith.constant 0 : index
    %c0_25 = arith.constant 0 : index
    %39 = vector.load %arg3[%c1, %c0_24, %c0_25] : memref<2x128x256xf32, #tpu.memory_space<vmem>>, vector<1x128x256xf32>
    %40 = vector.shape_cast %39 : vector<1x128x256xf32> to vector<128x256xf32>
    %c0_26 = arith.constant 0 : index
    %c0_27 = arith.constant 0 : index
    %41 = vector.load %arg4[%c0_26, %c0_27] : memref<64x128xf32, #tpu.memory_space<vmem>>, vector<64x128xf32>
    %cst_28 = arith.constant dense<0.000000e+00> : vector<64x256xf32>
    %42 = tpu.matmul %41, %40, %cst_28 {dimension_numbers = #tpu.dot_dimension_numbers<[1], [0], [0], [1], [0, 0, 1, 1], [], []>} : vector<64x128xf32>, vector<128x256xf32>, vector<64x256xf32> -> vector<64x256xf32>
    %c0_29 = arith.constant 0 : index
    %c0_30 = arith.constant 0 : index
    %43 = vector.load %arg5[%c0_29, %c0_30] : memref<64x1xf32, #tpu.memory_space<vmem>>, vector<64x1xf32>
    %44 = vector.broadcast %43 : vector<64x1xf32> to vector<64x256xf32>
    %45 = arith.addf %42, %44 : vector<64x256xf32>
    %cst_31 = arith.constant 1.000000e-01 : f32
    %46 = vector.broadcast %cst_31 : f32 to vector<64x256xf32>
    %47 = arith.mulf %46, %45 : vector<64x256xf32>
    %48 = arith.maximumf %45, %47 : vector<64x256xf32>
    %c0_32 = arith.constant 0 : index
    %c0_33 = arith.constant 0 : index
    %49 = vector.load %arg6[%c0_32, %c0_33] : memref<64x64xf32, #tpu.memory_space<vmem>>, vector<64x64xf32>
    %cst_34 = arith.constant dense<0.000000e+00> : vector<64x256xf32>
    %50 = tpu.matmul %49, %48, %cst_34 {dimension_numbers = #tpu.dot_dimension_numbers<[1], [0], [0], [1], [0, 0, 1, 1], [], []>} : vector<64x64xf32>, vector<64x256xf32>, vector<64x256xf32> -> vector<64x256xf32>
    %c0_35 = arith.constant 0 : index
    %c0_36 = arith.constant 0 : index
    %51 = vector.load %arg7[%c0_35, %c0_36] : memref<64x1xf32, #tpu.memory_space<vmem>>, vector<64x1xf32>
    %52 = vector.broadcast %51 : vector<64x1xf32> to vector<64x256xf32>
    %53 = arith.addf %50, %52 : vector<64x256xf32>
    %cst_37 = arith.constant 1.000000e-01 : f32
    %54 = vector.broadcast %cst_37 : f32 to vector<64x256xf32>
    %55 = arith.mulf %54, %53 : vector<64x256xf32>
    %56 = arith.maximumf %53, %55 : vector<64x256xf32>
    %c1_i32 = arith.constant 1 : i32
    %57 = arith.addi %0, %c1_i32 : i32
    %58 = arith.index_cast %57 : i32 to index
    %59 = memref.load %arg2[%58] : memref<2xi32, #tpu.memory_space<smem>>
    %60 = arith.index_cast %59 : i32 to index
    %c0_38 = arith.constant 0 : index
    %c0_39 = arith.constant 0 : index
    %61 = vector.load %arg8[%60, %c0_38, %c0_39] : memref<5x8x64xf32, #tpu.memory_space<vmem>>, vector<1x8x64xf32>
    %62 = vector.shape_cast %61 : vector<1x8x64xf32> to vector<8x64xf32>
    %cst_40 = arith.constant dense<0.000000e+00> : vector<8x256xf32>
    %63 = tpu.matmul %62, %56, %cst_40 {dimension_numbers = #tpu.dot_dimension_numbers<[1], [0], [0], [1], [0, 0, 1, 1], [], []>} : vector<8x64xf32>, vector<64x256xf32>, vector<8x256xf32> -> vector<8x256xf32>
    %64 = arith.index_cast %59 : i32 to index
    %c0_41 = arith.constant 0 : index
    %c0_42 = arith.constant 0 : index
    %65 = vector.load %arg9[%64, %c0_41, %c0_42] : memref<5x8x1xf32, #tpu.memory_space<vmem>>, vector<1x8x1xf32>
    %66 = vector.shape_cast %65 : vector<1x8x1xf32> to vector<8x1xf32>
    %67 = vector.broadcast %66 : vector<8x1xf32> to vector<8x256xf32>
    %68 = arith.addf %63, %67 : vector<8x256xf32>
    %69 = vector.extract_strided_slice %68 {offsets = [0, 0], sizes = [3, 256], strides = [1, 1]} : vector<8x256xf32> to vector<3x256xf32>
    %c1_43 = arith.constant 1 : index
    %c0_44 = arith.constant 0 : index
    %c0_45 = arith.constant 0 : index
    %70 = vector.load %arg10[%c1_43, %c0_44, %c0_45] : memref<2x3x256xf32, #tpu.memory_space<vmem>>, vector<1x3x256xf32>
    %71 = vector.shape_cast %70 : vector<1x3x256xf32> to vector<3x256xf32>
    %72 = vector.shape_cast %69 : vector<3x256xf32> to vector<1x3x256xf32>
    tpu.vector_store %arg10[%c1_43, %c0_44, %c0_45], %72 {strides = array<i32>} : memref<2x3x256xf32, #tpu.memory_space<vmem>>, vector<1x3x256xf32>,
    %73 = vector.extract_strided_slice %68 {offsets = [3, 0], sizes = [4, 256], strides = [1, 1]} : vector<8x256xf32> to vector<4x256xf32>
    %c1_46 = arith.constant 1 : index
    %c0_47 = arith.constant 0 : index
    %c0_48 = arith.constant 0 : index
    %74 = vector.load %arg11[%c1_46, %c0_47, %c0_48] : memref<2x4x256xf32, #tpu.memory_space<vmem>>, vector<1x4x256xf32>
    %75 = vector.shape_cast %74 : vector<1x4x256xf32> to vector<4x256xf32>
    %76 = vector.shape_cast %73 : vector<4x256xf32> to vector<1x4x256xf32>
    tpu.vector_store %arg11[%c1_46, %c0_47, %c0_48], %76 {strides = array<i32>} : memref<2x4x256xf32, #tpu.memory_space<vmem>>, vector<1x4x256xf32>,
    return
  }
  func.func @transform_0(%arg0: i32, %arg1: i32, %arg2: memref<2xi32, #tpu.memory_space<smem>>) -> (i32, i32, i32) {
    %c0_i32 = arith.constant 0 : i32
    %c0_i32_0 = arith.constant 0 : i32
    return %arg0, %c0_i32, %arg1 : i32, i32, i32
  }
  func.func @transform_1(%arg0: i32, %arg1: i32, %arg2: memref<2xi32, #tpu.memory_space<smem>>) -> (i32, i32) {
    %c0_i32 = arith.constant 0 : i32
    %c0_i32_0 = arith.constant 0 : i32
    %c0_i32_1 = arith.constant 0 : i32
    return %c0_i32, %c0_i32_0 : i32, i32
  }
  func.func @transform_2(%arg0: i32, %arg1: i32, %arg2: memref<2xi32, #tpu.memory_space<smem>>) -> (i32, i32) {
    %c0_i32 = arith.constant 0 : i32
    %c0_i32_0 = arith.constant 0 : i32
    %c0_i32_1 = arith.constant 0 : i32
    return %c0_i32, %c0_i32_0 : i32, i32
  }
  func.func @transform_3(%arg0: i32, %arg1: i32, %arg2: memref<2xi32, #tpu.memory_space<smem>>) -> (i32, i32) {
    %c0_i32 = arith.constant 0 : i32
    %c0_i32_0 = arith.constant 0 : i32
    %c0_i32_1 = arith.constant 0 : i32
    return %c0_i32, %c0_i32_0 : i32, i32
  }
  func.func @transform_4(%arg0: i32, %arg1: i32, %arg2: memref<2xi32, #tpu.memory_space<smem>>) -> (i32, i32) {
    %c0_i32 = arith.constant 0 : i32
    %c0_i32_0 = arith.constant 0 : i32
    %c0_i32_1 = arith.constant 0 : i32
    return %c0_i32, %c0_i32_0 : i32, i32
  }
  func.func @transform_5(%arg0: i32, %arg1: i32, %arg2: memref<2xi32, #tpu.memory_space<smem>>) -> (i32, i32, i32) {
    %c0_i32 = arith.constant 0 : i32
    %c0_i32_0 = arith.constant 0 : i32
    %c0_i32_1 = arith.constant 0 : i32
    %c0_i32_2 = arith.constant 0 : i32
    return %c0_i32, %c0_i32_0, %c0_i32_1 : i32, i32, i32
  }
  func.func @transform_6(%arg0: i32, %arg1: i32, %arg2: memref<2xi32, #tpu.memory_space<smem>>) -> (i32, i32, i32) {
    %c0_i32 = arith.constant 0 : i32
    %c0_i32_0 = arith.constant 0 : i32
    %c0_i32_1 = arith.constant 0 : i32
    %c0_i32_2 = arith.constant 0 : i32
    return %c0_i32, %c0_i32_0, %c0_i32_1 : i32, i32, i32
  }
  func.func @transform_7(%arg0: i32, %arg1: i32, %arg2: memref<2xi32, #tpu.memory_space<smem>>) -> (i32, i32, i32) {
    %c0_i32 = arith.constant 0 : i32
    %c0_i32_0 = arith.constant 0 : i32
    return %arg0, %c0_i32, %arg1 : i32, i32, i32
  }
  func.func @transform_8(%arg0: i32, %arg1: i32, %arg2: memref<2xi32, #tpu.memory_space<smem>>) -> (i32, i32, i32) {
    %c0_i32 = arith.constant 0 : i32
    %c0_i32_0 = arith.constant 0 : i32
    return %arg0, %c0_i32, %arg1 : i32, i32, i32
  }
}

</mosaic_0001>

<bundles_post_ra>
// kernel: tpu_custom_call.1
= control target key start
LH: loop header
LB: loop body
LE: loop exit
PB: predicated region body
PF: predicated region fallthrough
CT: control target
= control target key end

     0   :  { %s1873_s0 = inlined_call_operand.vmem [shape: s32[2], index: 0, kind: input, shape index: {}]   ;;  %s1874_s1 = inlined_call_operand.hbm [shape: f32[2,128,256], index: 1, kind: input, shape index: {}]   ;;  %s1875_s2 = inlined_call_operand.vmem [shape: f32[64,128], index: 2, kind: input, shape index: {}]   ;;  %s1876_s3 = inlined_call_operand.vmem [shape: f32[64,1], index: 3, kind: input, shape index: {}]   ;;  %s1877_s4 = inlined_call_operand.vmem [shape: f32[64,64], index: 4, kind: input, shape index: {}]   ;;  %s1878_s5 = inlined_call_operand.vmem [shape: f32[64,1], index: 5, kind: input, shape index: {}]   ;;  %s1879_s6 = inlined_call_operand.vmem [shape: f32[5,8,64], index: 6, kind: input, shape index: {}]   ;;  %s1880_s7 = inlined_call_operand.vmem [shape: f32[5,8,1], index: 7, kind: input, shape index: {}]   ;;  %s1881_s8 = inlined_call_operand.vmem [shape: f32[2,3,256], index: 8, kind: output, shape index: {0}]   ;;  %s1882_s9 = inlined_call_operand.hbm [shape: f32[2,4,256], index: 9, kind: output, shape index: {1}]  }
   0x1   :  { %s15_s11 = sshll.u32 %s1873_s0, 4  ;;  %s16_s11 = int_to_ptr.vmem [resolvable:$true] %s15_s11 }
   0x2   :  { %s1361_s12 = scalar_lea.vmem %s16_s11, 16  ;;  %p1366_p1 = scmp.lt.s32.totalorder %s16_s11, %s16_s11 }
   0x3   :  { %p1362_p0 = scmp.ne.s32.totalorder %s16_s11, %s1361_s12  ;;  %p1367_p2 = scmp.lt.s32.totalorder %s1361_s12, %s1361_s12 }
   0x5   :  { %p1368_p3 = por %p1367_p2, %p1366_p1 }
   0x7   :  { %p1369_p4 = pnand %p1368_p3, %p1362_p0 }
   0x9   :  { %1372 = shalt.err (!%p1369_p4)  }
   0xa   :  { %s1423_s13 = smov [#allocation3]  }
   0xb   :  { %18 = dma.vmem_to_smem %s16_s11, 16, %s1423_s13, [#allocation2] }
   0xc   :  { %1417 = dma.done.wait [#allocation2], 16 }
   0xd   :  { %1418 = vsyncadd [#allocation2], 4294967280 }
   0xe   :  { %20 = sfence }
   0xf   :  { %21 = vsyncpa [#allocation5], 0 }
  0x10   :  { %22 = vsyncpa [#allocation6], 0  ;;  %s1424_s14 = smov [#allocation4]   ;;  %s1373_s17 = scalar_lea.hbm %s1874_s1, 8192 }
  0x11   :  { %s28_s15 = sshll.u32 %s1424_s14, 4  ;;  %p1374_p5 = scmp.ne.s32.totalorder %s1874_s1, %s1373_s17  ;;  %s29_s15 = int_to_ptr.vmem [resolvable:$true] %s28_s15 }
  0x12   :  { %p1377_p6 = scmp.lt.u32.totalorder %s1373_s17, %s1874_s1 }
  0x14   :  { %p1379_p7 = pnand %p1377_p6, %p1374_p5 }
  0x16   :  { %1382 = shalt.err (!%p1379_p7)
}
  0x17   :  { %s1383_s22 = scalar_lea.vmem %s29_s15, 8192  ;;  %p1388_p9 = scmp.lt.s32.totalorder %s29_s15, %s29_s15 }
  0x18   :  { %p1384_p8 = scmp.ne.s32.totalorder %s29_s15, %s1383_s22  ;;  %p1389_p10 = scmp.lt.s32.totalorder %s1383_s22, %s1383_s22 }
  0x1a   :  { %p1390_p11 = por %p1389_p10, %p1388_p9 }
  0x1c   :  { %p1391_p12 = pnand %p1390_p11, %p1384_p8 }
  0x1e   :  { %1394 = shalt.err (!%p1391_p12)
}
  0x1f   :  { %s1425_s23 = smov 256   ;;  %s1426_s24 = smov 16  }
  0x20   :  { %34 = dma.hbm_to_vmem [thread:$0]  %s1874_s1, 8192, %s29_s15, [#allocation5], %s1425_s23, %s1425_s23, %s1426_s24  }
  0x21   :  { %1419 = dma.done.wait [#allocation5], 8192  }
  0x22   :  { %1420 = vsyncadd [#allocation5], 4294959104  ;;  %v1427_v0 = vmov 0.0   ;;  %v1428_v1 = vmov 0   ;;  %v52_v2 = vld [vmem:[#allocation4 + $0x8] sm:$0xff]  ;;  %v54_v3 = vld [vmem:[#allocation4 + $0x18] sm:$0xff] }
  0x23   :  { %203 = vmatprep.mubr.f32.mxu0 %v1427_v0  ;;  %1359 = vset.pattern.permute.xlu0 %v1428_v1  ;;  %v51_v4 = vld [vmem:[#allocation4] sm:$0xff]  ;;  %v1222_v5 = vpack.c.bf16 %v54_v3, %v52_v2  ;;  %v53_v6 = vld [vmem:[#allocation4 + $0x10] sm:$0xff]  ;;  %v56_v7 = vld [vmem:[#allocation4 + $0x28] sm:$0xff]  ;;  %s1651_s26 = sld [smem:[#allocation3 + $0x1]]  ;;  %vm340_vm0 = vcmask 523264   ;;  %vm601_vm1 = vcmask 1040384  }
  0x24   :  { %1360 = vset.pattern.permute.xlu1 %v1428_v1  ;;  %429 = vmatprep.mubr.f32.mxu1 %v1427_v0  ;;  %v58_v8 = vld [vmem:[#allocation4 + $0x38] sm:$0xff]  ;;  %v1224_v9 = vpack.c.bf16 %v53_v6, %v51_v4  ;;  %v55_v11 = vld [vmem:[#allocation4 + $0x20] sm:$0xff]  ;;  %v57_v12 = vld [vmem:[#allocation4 + $0x30] sm:$0xff]  ;;  %vm602_vm2 = vcmask 1044484   ;;  %s1429_s11 = smov [#allocation7]  }
  0x25   :  { %v1226_v10 = vpack.c.bf16 %v58_v8, %v56_v7  ;;  %v60_v13 = vld [vmem:[#allocation4 + $0x48] sm:$0xff]  ;;  %1223 = vmatprep.subr.bf16.mxu0 %v1222_v5  ;;  %v62_v14 = vld [vmem:[#allocation4 + $0x58] sm:$0xff]  ;;  %v1228_v15 = vpack.c.bf16 %v57_v12, %v55_v11  ;;  %v59_v17 = vld [vmem:[#allocation4 + $0x40] sm:$0xff] }
  0x26   :  { %1225 = vmatpush1.bf16.msra.mxu0 %v1224_v9  ;;  %v1230_v16 = vpack.c.bf16 %v62_v14, %v60_v13  ;;  %v61_v18 = vld [vmem:[#allocation4 + $0x50] sm:$0xff]  ;;  %v64_v19 = vld [vmem:[#allocation4 + $0x68] sm:$0xff]  ;;  %v66_v20 = vld [vmem:[#allocation4 + $0x78] sm:$0xff] }
  0x27   :  { %1227 = vmatprep.subr.bf16.mxu0 %v1226_v10  ;;  %v1232_v21 = vpack.c.bf16 %v61_v18, %v59_v17  ;;  %v1234_v22 = vpack.c.bf16 %v66_v20, %v64_v19  ;;  %v63_v23 = vld [vmem:[#allocation4 + $0x60] sm:$0xff]  ;;  %v65_v24 = vld [vmem:[#allocation4 + $0x70] sm:$0xff]  ;;  %v68_v25 = vld [vmem:[#allocation4 + $0x88] sm:$0xff] }
  0x28   :  { %v70_v26 = vld [vmem:[#allocation4 + $0x98] sm:$0xff]  ;;  %v1236_v27 = vpack.c.bf16 %v65_v24, %v63_v23  ;;  %v67_v29 = vld [vmem:[#allocation4 + $0x80] sm:$0xff]  ;;  %v69_v30 = vld [vmem:[#allocation4 + $0x90] sm:$0xff] }
  0x29   :  { %v1238_v28 = vpack.c.bf16 %v70_v26, %v68_v25  ;;  %v72_v31 = vld [vmem:[#allocation4 + $0xa8] sm:$0xff]  ;;  %v74_v32 = vld [vmem:[#allocation4 + $0xb8] sm:$0xff]  ;;  %v1240_v33 = vpack.c.bf16 %v69_v30, %v67_v29  ;;  %v71_v35 = vld [vmem:[#allocation4 + $0xa0] sm:$0xff]  ;;  %s1218_s27 = sshll.u32 %s1651_s26, 3 }
  0x2a   :  { %1229 = vmatpush1.bf16.msra.mxu0 %v1228_v15  ;;  %v1242_v34 = vpack.c.bf16 %v74_v32, %v72_v31  ;;  %v73_v36 = vld [vmem:[#allocation4 + $0xb0] sm:$0xff]  ;;  %v76_v37 = vld [vmem:[#allocation4 + $0xc8] sm:$0xff]  ;;  %v78_v38 = vld [vmem:[#allocation4 + $0xd8] sm:$0xff]  ;;  %s1074_s12 = scalar_lea.vmem %s1880_s7, %s1218_s27  ;;  %s1072_s10 = scalar_lea.vmem %s1879_s6, %s1218_s27 }
  0x2b   :  { %1231 = vmatprep.subr.bf16.mxu0 %v1230_v16  ;;  %v1244_v39 = vpack.c.bf16 %v73_v36, %v71_v35  ;;  %v1246_v40 = vpack.c.bf16 %v78_v38, %v76_v37  ;;  %v75_v41 = vld [vmem:[#allocation4 + $0xc0] sm:$0xff]  ;;  %v77_v42 = vld [vmem:[#allocation4 + $0xd0] sm:$0xff]  ;;  %v80_v43 = vld [vmem:[#allocation4 + $0xe8] sm:$0xff] }
  0x2c   :  { %v82_v44 = vld [vmem:[#allocation4 + $0xf8] sm:$0xff]  ;;  %v1248_v45 = vpack.c.bf16 %v77_v42, %v75_v41  ;;  %v1502_v46 = vld [vmem:[%s1876_s3] sm:$0xff]  ;;  %v1507_v47 = vld [vmem:[%s1876_s3 + $0x10] sm:$0xff] }
  0x2d   :  { %v1250_v48 = vpack.c.bf16 %v82_v44, %v80_v43  ;;  %v79_v49 = vld [vmem:[#allocation4 + $0xe0] sm:$0xff]  ;;  %v81_v50 = vld [vmem:[#allocation4 + $0xf0] sm:$0xff]  ;;  %101 = vperm.xlu0 %1359, %v1502_v46   ;;  %v612_v51 = vld [vmem:[#allocation4 + $0x108] sm:$0xff]  ;;  %111 = vperm.xlu1 %1360, %v1507_v47  }
  0x2e   :  { %1233 = vmatpush1.bf16.msra.mxu0 %v1232_v21  ;;  %v614_v52 = vld [vmem:[#allocation4 + $0x118] sm:$0xff]  ;;  %v1514_v53 = vld [vmem:[%s1876_s3 + $0x8] sm:$0xff]  ;;  %v1252_v55 = vpack.c.bf16 %v81_v50, %v79_v49  ;;  %v611_v57 = vld [vmem:[#allocation4 + $0x100] sm:$0xff] }
  0x2f   :  { %1235 = vmatprep.subr.bf16.mxu0 %v1234_v22  ;;  %v1519_v54 = vld [vmem:[%s1876_s3 + $0x18] sm:$0xff]  ;;  %v1286_v56 = vpack.c.bf16 %v614_v52, %v612_v51  ;;  %v613_v58 = vld [vmem:[#allocation4 + $0x110] sm:$0xff]  ;;  %v616_v59 = vld [vmem:[#allocation4 + $0x128] sm:$0xff] }
  0x30   :  { %v618_v60 = vld [vmem:[#allocation4 + $0x138] sm:$0xff]  ;;  %v1526_v61 = vld [vmem:[%s1876_s3 + $0x20] sm:$0xff]  ;;  %v1531_v62 = vld [vmem:[%s1876_s3 + $0x28] sm:$0xff]  ;;  %v1288_v1 = vpack.c.bf16 %v613_v58, %v611_v57 }
  0x31   :  { %106 = vperm.xlu0 %1359, %v1514_v53   ;;  %116 = vperm.xlu1 %1360, %v1519_v54   ;;  %v1536_v63 = vld [vmem:[%s1875_s2] sm:$0xff]  ;;  %v1290_v2 = vpack.c.bf16 %v618_v60, %v616_v59  ;;  %v617_v4 = vld [vmem:[#allocation4 + $0x130] sm:$0xff]  ;;  %v620_v5 = vld [vmem:[#allocation4 + $0x148] sm:$0xff] }
  0x32   :  { %1237 = vmatpush1.bf16.msra.mxu0 %v1236_v27  ;;  %v615_v3 = vld [vmem:[#allocation4 + $0x120] sm:$0xff]  ;;  %v622_v6 = vld [vmem:[#allocation4 + $0x158] sm:$0xff]  ;;  %v1543_v7 = vld [vmem:[%s1876_s3 + $0x30] sm:$0xff] }
  0x33   :  { %1239 = vmatprep.subr.bf16.mxu0 %v1238_v28  ;;  %v1549_v8 = vld [vmem:[%s1876_s3 + $0x38] sm:$0xff]  ;;  %v1555_v9 = vld [vmem:[%s1875_s2 + $0x8] sm:$0xff]  ;;  %v1292_v10 = vpack.c.bf16 %v617_v4, %v615_v3  ;;  %v1294_v11 = vpack.c.bf16 %v622_v6, %v620_v5  ;;  %v619_v12 = vld [vmem:[#allocation4 + $0x140] sm:$0xff] }
  0x34   :  { %v621_v13 = vld [vmem:[#allocation4 + $0x150] sm:$0xff]  ;;  %v624_v14 = vld [vmem:[#allocation4 + $0x168] sm:$0xff]  ;;  %v626_v15 = vld [vmem:[#allocation4 + $0x178] sm:$0xff] }
  0x35   :  { %121 = vperm.xlu0 %1359, %v1526_v61   ;;  %126 = vperm.xlu1 %1360, %v1531_v62   ;;  %v1562_v16 = vld [vmem:[%s1878_s5] sm:$0xff]  ;;  %v1568_v17 = vld [vmem:[%s1878_s5 + $0x8] sm:$0xff]  ;;  %v1574_v18 = vld [vmem:[%s1875_s2 + $0x10] sm:$0xff]  ;;  %v1296_v19 = vpack.c.bf16 %v621_v13, %v619_v12  ;;  %v1298_v20 = vpack.c.bf16 %v626_v15, %v624_v14 }
  0x36   :  { %1241 = vmatpush1.bf16.msra.mxu0 %v1240_v33  ;;  %v623_v21 = vld [vmem:[#allocation4 + $0x160] sm:$0xff]  ;;  %v625_v22 = vld [vmem:[#allocation4 + $0x170] sm:$0xff]  ;;  %v628_v23 = vld [vmem:[#allocation4 + $0x188] sm:$0xff] }
  0x37   :  { %1243 = vmatprep.subr.bf16.mxu0 %v1242_v34  ;;  %v630_v24 = vld [vmem:[#allocation4 + $0x198] sm:$0xff]  ;;  %v1581_v25 = vld [vmem:[%s1878_s5 + $0x10] sm:$0xff]  ;;  %v1300_v28 = vpack.c.bf16 %v625_v22, %v623_v21  ;;  %v627_v30 = vld [vmem:[#allocation4 + $0x180] sm:$0xff] }
  0x38   :  { %v1587_v26 = vld [vmem:[%s1878_s5 + $0x18] sm:$0xff]  ;;  %v1302_v29 = vpack.c.bf16 %v630_v24, %v628_v23  ;;  %v629_v31 = vld [vmem:[#allocation4 + $0x190] sm:$0xff]  ;;  %v632_v32 = vld [vmem:[#allocation4 + $0x1a8] sm:$0xff] }
  0x39   :  { %131 = vperm.xlu0 %1359, %v1543_v7   ;;  %136 = vperm.xlu1 %1360, %v1549_v8   ;;  %v1593_v27 = vld [vmem:[%s1875_s2 + $0x18] sm:$0xff]  ;;  %v1600_v34 = vld [vmem:[%s1878_s5 + $0x20] sm:$0xff]  ;;  %v1606_v35 = vld [vmem:[%s1878_s5 + $0x28] sm:$0xff]  ;;  %v1304_v37 = vpack.c.bf16 %v629_v31, %v627_v30 }
  0x3a   :  { %1245 = vmatpush1.bf16.msra.mxu0 %v1244_v39  ;;  %v634_v33 = vld [vmem:[#allocation4 + $0x1b8] sm:$0xff]  ;;  %v1612_v36 = vld [vmem:[%s1875_s2 + $0x20] sm:$0xff]  ;;  %v636_v41 = vld [vmem:[#allocation4 + $0x1c8] sm:$0xff] }
  0x3b   :  { %1247 = vmatprep.subr.bf16.mxu0 %v1246_v40  ;;  %v1306_v38 = vpack.c.bf16 %v634_v33, %v632_v32  ;;  %v631_v39 = vld [vmem:[#allocation4 + $0x1a0] sm:$0xff]  ;;  %v633_v40 = vld [vmem:[#allocation4 + $0x1b0] sm:$0xff]  ;;  %v638_v42 = vld [vmem:[#allocation4 + $0x1d8] sm:$0xff] }
  0x3c   :  { %v298_v43 = vld [vmem:[%s1878_s5 + $0x30] sm:$0xff]  ;;  %v299_v44 = vld [vmem:[%s1878_s5 + $0x38] sm:$0xff]  ;;  %v1310_v49 = vpack.c.bf16 %v638_v42, %v636_v41  ;;  %v635_v50 = vld [vmem:[#allocation4 + $0x1c0] sm:$0xff] }
  0x3d   :  { %302 = vperm.xlu0 %1359, %v1562_v16   ;;  %307 = vperm.xlu1 %1360, %v1568_v17   ;;  %v637_v51 = vld [vmem:[#allocation4 + $0x1d0] sm:$0xff]  ;;  %v640_v52 = vld [vmem:[#allocation4 + $0x1e8] sm:$0xff]  ;;  %v639_v59 = vld [vmem:[#allocation4 + $0x1e0] sm:$0xff] }
  0x3e   :  { %1249 = vmatpush1.bf16.msra.mxu0 %v1248_v45  ;;  %v88_v45 = vld [vmem:[%s1875_s2 + $0x28] sm:$0xff]  ;;  %v1312_v57 = vpack.c.bf16 %v637_v51, %v635_v50  ;;  %v641_v60 = vld [vmem:[#allocation4 + $0x1f0] sm:$0xff]  ;;  %vm1839_vm3 = vmor %vm601_vm1, %vm602_vm2 }
  0x3f   :  { %1251 = vmatprep.subr.bf16.mxu0 %v1250_v48  ;;  %v1308_v48 = vpack.c.bf16 %v633_v40, %v631_v39 }
  0x41   :  { %312 = vperm.xlu0 %1359, %v1581_v25   ;;  %317 = vperm.xlu1 %1360, %v1587_v26  }
  0x42   :  { %1253 = vmatpush1.bf16.msra.mxu0 %v1252_v55  ;;  %v642_v55 = vld [vmem:[#allocation4 + $0x1f8] sm:$0xff] }
  0x43   :  { %1287 = vmatprep.subr.bf16.mxu0 %v1286_v56  ;;  %v89_v56 = vld [vmem:[%s1875_s2 + $0x30] sm:$0xff]  ;;  %v1314_v58 = vpack.c.bf16 %v642_v55, %v640_v52 }
  0x45   :  { %204 = vmatmul.mubr.f32.vlgmr.msra.gmra.mrb[0].mxu0 %v1536_v63  ;;  %322 = vperm.xlu0 %1359, %v1600_v34  }
  0x46   :  { %1289 = vmatpush1.bf16.msra.mxu0 %v1288_v1  ;;  %209 = vmatprep.mubr.f32.mxu0 %v1427_v0  ;;  %v90_v1 = vld [vmem:[%s1875_s2 + $0x38] sm:$0xff]  ;;  %s1648_s2 = sld [smem:[#allocation3]] }
  0x47   :  { %1291 = vmatprep.subr.bf16.mxu0 %v1290_v2  ;;  %327 = vperm.xlu1 %1360, %v1606_v35   ;;  %v1316_v2 = vpack.c.bf16 %v641_v60, %v639_v59 }
  0x49   :  { %210 = vmatmul.mubr.f32.gmra.mrb[2].mxu0 %v1555_v9  ;;  %332 = vperm.xlu0 %1359, %v298_v43  }
  0x4a   :  { %1293 = vmatpush1.bf16.msra.mxu0 %v1292_v10  ;;  %215 = vmatprep.mubr.f32.mxu0 %v1427_v0 }
  0x4b   :  { %1295 = vmatprep.subr.bf16.mxu0 %v1294_v11  ;;  %337 = vperm.xlu1 %1360, %v299_v44  }
  0x4c   :  { %s1206_s1 = sshll.u32 %s1648_s2, 3 }
  0x4d   :  { %216 = vmatmul.mubr.f32.gmra.mrb[4].mxu0 %v1574_v18  ;;  %661 = vperm.xlu0 %1359, %v1502_v46   ;;  %s514_s30 = scalar_lea.vmem %s1880_s7, %s1206_s1  ;;  %s512_s28 = scalar_lea.vmem %s1879_s6, %s1206_s1 }
  0x4e   :  { %1297 = vmatpush1.bf16.msra.mxu0 %v1296_v19  ;;  %221 = vmatprep.mubr.f32.mxu0 %v1427_v0  ;;  %v515_v46 = vld [vmem:[%s514_s30] sm:$0xff] }
  0x4f   :  { %1299 = vmatprep.subr.bf16.mxu0 %v1298_v20  ;;  %666 = vperm.xlu1 %1360, %v1514_v53  }
  0x51   :  { %222 = vmatmul.mubr.f32.gmra.mrb[6].mxu0 %v1593_v27  ;;  %671 = vperm.xlu0 %1359, %v1507_v47   ;;  %v1075_v47 = vld [vmem:[%s1074_s12] sm:$0xff]  ;;  %s1176_s12 = sshll.u32 %s1429_s11, 4  ;;  %s1177_s12 = int_to_ptr.vmem [resolvable:$true] %s1176_s12 }
  0x52   :  { %1301 = vmatpush1.bf16.msra.mxu0 %v1300_v28  ;;  %227 = vmatprep.mubr.f32.mxu0 %v1427_v0  ;;  %s1395_s6 = scalar_lea.vmem %s1177_s12, 256  ;;  %p1400_p0 = scmp.lt.s32.totalorder %s1177_s12, %s1177_s12 }
  0x53   :  { %1303 = vmatprep.subr.bf16.mxu0 %v1302_v29  ;;  %676 = vperm.xlu1 %1360, %v1519_v54   ;;  %p1396_p13 = scmp.ne.s32.totalorder %s1177_s12, %s1395_s6  ;;  %p1401_p1 = scmp.lt.s32.totalorder %s1395_s6, %s1395_s6 }
  0x55   :  { %228 = vmatmul.mubr.f32.gmra.mrb[8].mxu0 %v1612_v36  ;;  %681 = vperm.xlu0 %1359, %v1526_v61   ;;  %p1402_p2 = por %p1401_p1, %p1400_p0 }
  0x56   :  { %1305 = vmatpush1.bf16.msra.mxu0 %v1304_v37  ;;  %233 = vmatprep.mubr.f32.mxu0 %v1427_v0 }
  0x57   :  { %1307 = vmatprep.subr.bf16.mxu0 %v1306_v38  ;;  %686 = vperm.xlu1 %1360, %v1531_v62   ;;  %p1403_p3 = pnand %p1402_p2, %p1396_p13 }
  0x59   :  { %234 = vmatmul.mubr.f32.gmra.mrb[10].mxu0 %v88_v45  ;;  %691 = vperm.xlu0 %1359, %v1543_v7  }
  0x5a   :  { %1309 = vmatpush1.bf16.msra.mxu0 %v1308_v48  ;;  %239 = vmatprep.mubr.f32.mxu0 %v1427_v0 }
  0x5b   :  { %1311 = vmatprep.subr.bf16.mxu0 %v1310_v49  ;;  %696 = vperm.xlu1 %1360, %v1549_v8  }
  0x5d   :  { %240 = vmatmul.mubr.f32.gmra.mrb[12].mxu0 %v89_v56  ;;  %862 = vperm.xlu0 %1359, %v1562_v16  }
  0x5e   :  { %1313 = vmatpush1.bf16.msra.mxu0 %v1312_v57  ;;  %245 = vmatprep.mubr.f32.mxu0 %v1427_v0 }
  0x5f   :  { %1315 = vmatprep.subr.bf16.mxu0 %v1314_v58  ;;  %867 = vperm.xlu1 %1360, %v1568_v17  }
  0x61   :  { %246 = vmatmul.mubr.f32.gmra.mrb[14].mxu0 %v90_v1  ;;  %872 = vperm.xlu0 %1359, %v1581_v25  }
  0x62   :  { %1317 = vmatpush1.bf16.msra.mxu0 %v1316_v2  ;;  %763 = vmatprep.mubr.f32.mxu0 %v1427_v0 }
  0x63   :  { %877 = vperm.xlu1 %1360, %v1587_v26  }
  0x65   :  { %764 = vmatmul.mubr.f32.vlgmr.msra.gmra.mrb[16].mxu0 %v1536_v63  ;;  %882 = vperm.xlu0 %1359, %v1600_v34  }
  0x66   :  { %769 = vmatprep.mubr.f32.mxu0 %v1427_v0 }
  0x67   :  { %887 = vperm.xlu1 %1360, %v1606_v35  }
  0x69   :  { %770 = vmatmul.mubr.f32.gmra.mrb[18].mxu0 %v1555_v9  ;;  %892 = vperm.xlu0 %1359, %v298_v43  }
  0x6a   :  { %775 = vmatprep.mubr.f32.mxu0 %v1427_v0 }
  0x6b   :  { %897 = vperm.xlu1 %1360, %v299_v44  }
  0x6d   :  { %776 = vmatmul.mubr.f32.gmra.mrb[20].mxu0 %v1574_v18  ;;  %518 = vperm.xlu0 %1359, %v515_v46  }
  0x6e   :  { %781 = vmatprep.mubr.f32.mxu0 %v1427_v0 }
  0x6f   :  { %1078 = vperm.xlu1 %1360, %v1075_v47  }
  0x71   :  { %782 = vmatmul.mubr.f32.gmra.mrb[22].mxu0 %v1593_v27 }
  0x72   :  { %787 = vmatprep.mubr.f32.mxu0 %v1427_v0 }
  0x75   :  { %788 = vmatmul.mubr.f32.gmra.mrb[24].mxu0 %v1612_v36 }
  0x76   :  { %793 = vmatprep.mubr.f32.mxu0 %v1427_v0 }
  0x79   :  { %794 = vmatmul.mubr.f32.gmra.mrb[26].mxu0 %v88_v45 }
  0x7a   :  { %799 = vmatprep.mubr.f32.mxu0 %v1427_v0 }
  0x7d   :  { %800 = vmatmul.mubr.f32.gmra.mrb[28].mxu0 %v89_v56 }
  0x7e   :  { %805 = vmatprep.mubr.f32.mxu0 %v1427_v0 }
  0x81   :  { %806 = vmatmul.mubr.f32.gmra.mrb[30].mxu0 %v90_v1 }
  0x82   :  { %1148 = vmatprep.mubr.f32.mxu0 %v1427_v0 }
  0xac   :  { %v102_v53 = vpop.permute.xlu0 %101  ;;  %v112_v54 = vpop.permute.xlu1 %111 }
  0xb0   :  { %v107_v61 = vpop.permute.xlu0 %106  ;;  %v117_v62 = vpop.permute.xlu1 %116 }
  0xb4   :  { %v122_v63 = vpop.permute.xlu0 %121  ;;  %v127_v3 = vpop.permute.xlu1 %126 }
  0xb8   :  { %v1679_v7 = vpop.permute.xlu0 %131  ;;  %v1681_v13 = vpop.permute.xlu1 %136 }
  0xbc   :  { %v1683_v17 = vpop.permute.xlu0 %302  ;;  %v1685_v28 = vpop.permute.xlu1 %307 }
  0xc0   :  { %v1687_v34 = vpop.permute.xlu0 %312  ;;  %v1689_v44 = vpop.permute.xlu1 %317 }
  0xc4   :  { %v1691_v51 = vpop.permute.xlu0 %322 }
  0xc6   :  { %v1693_v2 = vpop.permute.xlu1 %327 }
 0x118   :  { %v205_v4 = vpop.f32.mrb[0].mxu0 }
 0x119   :  { %v206_v5 = vadd.f32 %v205_v4, %v102_v53  ;;  %v207_v6 = vpop.f32.mrb[1].mxu0 }
 0x11a   :  { %v208_v8 = vadd.f32 %v207_v6, %v102_v53 }
 0x11b   :  { %v252_v10 = vmul.f32 0.1, %v206_v5 }
 0x11c   :  { %v211_v9 = vpop.f32.mrb[2].mxu0  ;;  %v253_v14 = vmul.f32 0.1, %v208_v8 }
 0x11d   :  { %v212_v11 = vadd.f32 %v211_v9, %v107_v61  ;;  %v213_v12 = vpop.f32.mrb[3].mxu0  ;;  %v268_v20 = vmax.f32 %v206_v5, %v252_v10 }
 0x11e   :  { %v214_v15 = vadd.f32 %v213_v12, %v107_v61  ;;  %v269_v25 = vmax.f32 %v208_v8, %v253_v14  ;;  %v1700_v14 = vpop.permute.xlu1 %337 }
 0x11f   :  { %v254_v16 = vmul.f32 0.1, %v212_v11 }
 0x120   :  { %v255_v18 = vmul.f32 0.1, %v214_v15  ;;  %v217_v19 = vpop.f32.mrb[4].mxu0 }
 0x121   :  { %v270_v21 = vmax.f32 %v212_v11, %v254_v16  ;;  %v218_v22 = vadd.f32 %v217_v19, %v112_v54  ;;  %v219_v23 = vpop.f32.mrb[5].mxu0 }
 0x122   :  { %v220_v24 = vadd.f32 %v219_v23, %v112_v54  ;;  %v271_v26 = vmax.f32 %v214_v15, %v255_v18 }
 0x123   :  { %v1256_v27 = vpack.c.bf16 %v270_v21, %v268_v20  ;;  %v256_v31 = vmul.f32 0.1, %v218_v22 }
 0x124   :  { %v223_v29 = vpop.f32.mrb[6].mxu0  ;;  %v1254_v30 = vpack.c.bf16 %v271_v26, %v269_v25  ;;  %v257_v35 = vmul.f32 0.1, %v220_v24 }
 0x125   :  { %v224_v32 = vadd.f32 %v223_v29, %v117_v62  ;;  %v225_v33 = vpop.f32.mrb[7].mxu0  ;;  %v272_v40 = vmax.f32 %v218_v22, %v256_v31 }
 0x126   :  { %v226_v36 = vadd.f32 %v225_v33, %v117_v62  ;;  %1255 = vmatprep.subr.bf16.mxu1 %v1254_v30  ;;  %v273_v45 = vmax.f32 %v220_v24, %v257_v35  ;;  %v667_v30 = vpop.permute.xlu1 %666 }
 0x127   :  { %v258_v37 = vmul.f32 0.1, %v224_v32  ;;  %1257 = vmatpush1.bf16.msra.mxu1 %v1256_v27 }
 0x128   :  { %v259_v38 = vmul.f32 0.1, %v226_v36  ;;  %v229_v39 = vpop.f32.mrb[8].mxu0 }
 0x129   :  { %v274_v41 = vmax.f32 %v224_v32, %v258_v37  ;;  %v230_v42 = vadd.f32 %v229_v39, %v122_v63  ;;  %v231_v43 = vpop.f32.mrb[9].mxu0  ;;  %v1706_v39 = vld [vmem:[%s1877_s4] sm:$0xff] }
 0x12a   :  { %v275_v48 = vmax.f32 %v226_v36, %v259_v38  ;;  %v232_v49 = vadd.f32 %v231_v43, %v122_v63  ;;  %v1696_v63 = vpop.permute.xlu0 %332 }
 0x12b   :  { %v1260_v50 = vpack.c.bf16 %v274_v41, %v272_v40  ;;  %v260_v56 = vmul.f32 0.1, %v230_v42 }
 0x12c   :  { %v235_v52 = vpop.f32.mrb[10].mxu0  ;;  %v1258_v55 = vpack.c.bf16 %v275_v48, %v273_v45  ;;  %v261_v59 = vmul.f32 0.1, %v232_v49 }
 0x12d   :  { %v236_v57 = vadd.f32 %v235_v52, %v127_v3  ;;  %v237_v58 = vpop.f32.mrb[11].mxu0  ;;  %v276_v53 = vmax.f32 %v230_v42, %v260_v56 }
 0x12e   :  { %v238_v60 = vadd.f32 %v237_v58, %v127_v3  ;;  %1259 = vmatprep.subr.bf16.mxu1 %v1258_v55  ;;  %v277_v4 = vmax.f32 %v232_v49, %v261_v59  ;;  %v662_v19 = vpop.permute.xlu0 %661  ;;  %v677_v58 = vpop.permute.xlu1 %676 }
 0x12f   :  { %v262_v1 = vmul.f32 0.1, %v236_v57  ;;  %1261 = vmatpush1.bf16.msra.mxu1 %v1260_v50 }
 0x130   :  { %v263_v46 = vmul.f32 0.1, %v238_v60  ;;  %v241_v47 = vpop.f32.mrb[12].mxu0 }
 0x131   :  { %v278_v54 = vmax.f32 %v236_v57, %v262_v1  ;;  %v242_v61 = vadd.f32 %v241_v47, %v1679_v7  ;;  %v243_v62 = vpop.f32.mrb[13].mxu0  ;;  %v1716_v57 = vld [vmem:[%s1877_s4 + $0x8] sm:$0xff] }
 0x132   :  { %v279_v5 = vmax.f32 %v238_v60, %v263_v46  ;;  %v244_v6 = vadd.f32 %v243_v62, %v1679_v7  ;;  %v672_v40 = vpop.permute.xlu0 %671  ;;  %v1726_v62 = vld [vmem:[%s1877_s4 + $0x10] sm:$0xff] }
 0x133   :  { %v1264_v8 = vpack.c.bf16 %v278_v54, %v276_v53  ;;  %v264_v10 = vmul.f32 0.1, %v242_v61 }
 0x134   :  { %v247_v3 = vpop.f32.mrb[14].mxu0  ;;  %v1262_v9 = vpack.c.bf16 %v279_v5, %v277_v4  ;;  %v265_v15 = vmul.f32 0.1, %v244_v6 }
 0x135   :  { %v248_v11 = vadd.f32 %v247_v3, %v1681_v13  ;;  %v249_v12 = vpop.f32.mrb[15].mxu0  ;;  %v280_v22 = vmax.f32 %v242_v61, %v264_v10 }
 0x136   :  { %v250_v16 = vadd.f32 %v249_v12, %v1681_v13  ;;  %1263 = vmatprep.subr.bf16.mxu1 %v1262_v9  ;;  %v281_v25 = vmax.f32 %v244_v6, %v265_v15  ;;  %v682_v4 = vpop.permute.xlu0 %681 }
 0x137   :  { %v266_v18 = vmul.f32 0.1, %v248_v11  ;;  %1265 = vmatpush1.bf16.msra.mxu1 %v1264_v8 }
 0x138   :  { %v267_v20 = vmul.f32 0.1, %v250_v16  ;;  %v765_v21 = vpop.f32.mrb[16].mxu0 }
 0x139   :  { %v282_v7 = vmax.f32 %v248_v11, %v266_v18  ;;  %v766_v23 = vadd.f32 %v765_v21, %v662_v19  ;;  %v767_v24 = vpop.f32.mrb[17].mxu0  ;;  %v1736_v18 = vld [vmem:[%s1877_s4 + $0x18] sm:$0xff] }
 0x13a   :  { %v283_v26 = vmax.f32 %v250_v16, %v267_v20  ;;  %v768_v27 = vadd.f32 %v767_v24, %v662_v19  ;;  %v687_v19 = vpop.permute.xlu1 %686 }
 0x13b   :  { %v1268_v29 = vpack.c.bf16 %v282_v7, %v280_v22  ;;  %v812_v33 = vmul.f32 0.1, %v766_v23 }
 0x13c   :  { %v771_v31 = vpop.f32.mrb[18].mxu0  ;;  %v1266_v32 = vpack.c.bf16 %v283_v26, %v281_v25  ;;  %v813_v36 = vmul.f32 0.1, %v768_v27 }
 0x13d   :  { %v772_v35 = vadd.f32 %v771_v31, %v667_v30  ;;  %v773_v13 = vpop.f32.mrb[19].mxu0  ;;  %v828_v43 = vmax.f32 %v766_v23, %v812_v33 }
 0x13e   :  { %v774_v37 = vadd.f32 %v773_v13, %v667_v30  ;;  %1267 = vmatprep.subr.bf16.mxu1 %v1266_v32  ;;  %v829_v50 = vmax.f32 %v768_v27, %v813_v36  ;;  %v1746_v27 = vld [vmem:[%s1877_s4 + $0x20] sm:$0xff] }
 0x13f   :  { %v814_v38 = vmul.f32 0.1, %v772_v35  ;;  %1269 = vmatpush1.bf16.msra.mxu1 %v1268_v29  ;;  %v692_v29 = vpop.permute.xlu0 %691 }
 0x140   :  { %v815_v41 = vmul.f32 0.1, %v774_v37  ;;  %v777_v42 = vpop.f32.mrb[20].mxu0 }
 0x141   :  { %v830_v45 = vmax.f32 %v772_v35, %v814_v38  ;;  %v778_v48 = vadd.f32 %v777_v42, %v672_v40  ;;  %v779_v49 = vpop.f32.mrb[21].mxu0  ;;  %v697_v42 = vpop.permute.xlu1 %696 }
 0x142   :  { %v831_v52 = vmax.f32 %v774_v37, %v815_v41  ;;  %v780_v55 = vadd.f32 %v779_v49, %v672_v40  ;;  %1198 = vmatmul.mubr.msk.f32.vlgmr.msra.gmra.mrb[0].mxu1 %vm340_vm0, %v1706_v39  ;;  %v1756_v41 = vld [vmem:[%s1877_s4 + $0x28] sm:$0xff] }
 0x143   :  { %v1710_v56 = vpack.c.bf16 %v830_v45, %v828_v43  ;;  %435 = vmatprep.mubr.f32.mxu1 %v1427_v0  ;;  %v816_v1 = vmul.f32 0.1, %v778_v48 }
 0x144   :  { %v783_v59 = vpop.f32.mrb[22].mxu0  ;;  %v1718_v60 = vpack.c.bf16 %v831_v52, %v829_v50  ;;  %v817_v53 = vmul.f32 0.1, %v780_v55 }
 0x145   :  { %v784_v46 = vadd.f32 %v783_v59, %v677_v58  ;;  %v785_v47 = vpop.f32.mrb[23].mxu0  ;;  %v832_v8 = vmax.f32 %v778_v48, %v816_v1  ;;  %v1766_v59 = vld [vmem:[%s1877_s4 + $0x30] sm:$0xff] }
 0x146   :  { %v786_v54 = vadd.f32 %v785_v47, %v677_v58  ;;  %1199 = vmatmul.mubr.msk.f32.gmra.mrb[2].mxu1 %vm340_vm0, %v1716_v57  ;;  %v833_v11 = vmax.f32 %v780_v55, %v817_v53 }
 0x147   :  { %v818_v61 = vmul.f32 0.1, %v784_v46  ;;  %441 = vmatprep.mubr.f32.mxu1 %v1427_v0 }
 0x148   :  { %v819_v5 = vmul.f32 0.1, %v786_v54  ;;  %v789_v6 = vpop.f32.mrb[24].mxu0 }
 0x149   :  { %v834_v3 = vmax.f32 %v784_v46, %v818_v61  ;;  %v790_v9 = vadd.f32 %v789_v6, %v682_v4  ;;  %v791_v10 = vpop.f32.mrb[25].mxu0 }
 0x14a   :  { %v835_v12 = vmax.f32 %v786_v54, %v819_v5  ;;  %v792_v15 = vadd.f32 %v791_v10, %v682_v4  ;;  %1200 = vmatmul.mubr.msk.f32.gmra.mrb[4].mxu1 %vm340_vm0, %v1726_v62  ;;  %v1776_v4 = vld [vmem:[%s1877_s4 + $0x38] sm:$0xff] }
 0x14b   :  { %v1730_v16 = vpack.c.bf16 %v834_v3, %v832_v8  ;;  %447 = vmatprep.mubr.f32.mxu1 %v1427_v0  ;;  %v820_v22 = vmul.f32 0.1, %v790_v9 }
 0x14c   :  { %v795_v20 = vpop.f32.mrb[26].mxu0  ;;  %v1738_v21 = vpack.c.bf16 %v835_v12, %v833_v11  ;;  %v821_v24 = vmul.f32 0.1, %v792_v15 }
 0x14d   :  { %v796_v7 = vadd.f32 %v795_v20, %v687_v19  ;;  %v797_v23 = vpop.f32.mrb[27].mxu0  ;;  %v836_v32 = vmax.f32 %v790_v9, %v820_v22 }
 0x14e   :  { %v798_v25 = vadd.f32 %v797_v23, %v687_v19  ;;  %1201 = vmatmul.mubr.msk.f32.gmra.mrb[6].mxu1 %vm340_vm0, %v1736_v18  ;;  %v837_v36 = vmax.f32 %v792_v15, %v821_v24 }
 0x14f   :  { %v822_v26 = vmul.f32 0.1, %v796_v7  ;;  %453 = vmatprep.mubr.f32.mxu1 %v1427_v0 }
 0x150   :  { %v823_v30 = vmul.f32 0.1, %v798_v25  ;;  %v801_v31 = vpop.f32.mrb[28].mxu0 }
 0x151   :  { %v838_v33 = vmax.f32 %v796_v7, %v822_v26  ;;  %v802_v35 = vadd.f32 %v801_v31, %v692_v29  ;;  %v803_v13 = vpop.f32.mrb[29].mxu0 }
 0x152   :  { %v839_v37 = vmax.f32 %v798_v25, %v823_v30  ;;  %v804_v38 = vadd.f32 %v803_v13, %v692_v29  ;;  %1202 = vmatmul.mubr.msk.f32.gmra.mrb[8].mxu1 %vm340_vm0, %v1746_v27 }
 0x153   :  { %v1750_v40 = vpack.c.bf16 %v838_v33, %v836_v32  ;;  %459 = vmatprep.mubr.f32.mxu1 %v1427_v0  ;;  %v824_v48 = vmul.f32 0.1, %v802_v35 }
 0x154   :  { %v807_v43 = vpop.f32.mrb[30].mxu0  ;;  %v1758_v45 = vpack.c.bf16 %v839_v37, %v837_v36  ;;  %v825_v52 = vmul.f32 0.1, %v804_v38 }
 0x155   :  { %v808_v49 = vadd.f32 %v807_v43, %v697_v42  ;;  %v809_v50 = vpop.f32.mrb[31].mxu0  ;;  %v840_v46 = vmax.f32 %v802_v35, %v824_v48 }
 0x156   :  { %v810_v55 = vadd.f32 %v809_v50, %v697_v42  ;;  %1203 = vmatmul.mubr.msk.f32.gmra.mrb[10].mxu1 %vm340_vm0, %v1756_v41  ;;  %v841_v53 = vmax.f32 %v804_v38, %v825_v52 }
 0x157   :  { %v826_v58 = vmul.f32 0.1, %v808_v49  ;;  %465 = vmatprep.mubr.f32.mxu1 %v1427_v0 }
 0x158   :  { %v827_v1 = vmul.f32 0.1, %v810_v55 }
 0x159   :  { %v842_v47 = vmax.f32 %v808_v49, %v826_v58 }
 0x15a   :  { %v843_v54 = vmax.f32 %v810_v55, %v827_v1  ;;  %1204 = vmatmul.mubr.msk.f32.gmra.mrb[12].mxu1 %vm340_vm0, %v1766_v59 }
 0x15b   :  { %v1770_v61 = vpack.c.bf16 %v842_v47, %v840_v46  ;;  %471 = vmatprep.mubr.f32.mxu1 %v1427_v0 }
 0x15c   :  { %v1778_v5 = vpack.c.bf16 %v843_v54, %v841_v53 }
 0x15e   :  { %1205 = vmatmul.mubr.msk.f32.gmra.mrb[14].mxu1 %vm340_vm0, %v1776_v4 }
 0x15f   :  { %588 = vmatprep.mubr.f32.mxu1 %v1427_v0 }
 0x215   :  { %v431_v6 = vpop.f32.mrb[0].mxu1 }
 0x216   :  { %v432_v8 = vadd.f32 %v431_v6, %v1683_v17  ;;  %v433_v3 = vpop.f32.mrb[1].mxu1 }
 0x217   :  { %v434_v9 = vadd.f32 %v433_v3, %v1683_v17 }
 0x218   :  { %v478_v11 = vmul.f32 0.1, %v432_v8 }
 0x219   :  { %v437_v10 = vpop.f32.mrb[2].mxu1  ;;  %v479_v19 = vmul.f32 0.1, %v434_v9 }
 0x21a   :  { %v438_v12 = vadd.f32 %v437_v10, %v1685_v28  ;;  %v439_v15 = vpop.f32.mrb[3].mxu1  ;;  %v494_v24 = vmax.f32 %v432_v8, %v478_v11 }
 0x21b   :  { %v440_v20 = vadd.f32 %v439_v15, %v1685_v28  ;;  %v495_v30 = vmax.f32 %v434_v9, %v479_v19 }
 0x21c   :  { %v480_v22 = vmul.f32 0.1, %v438_v12 }
 0x21d   :  { %v481_v7 = vmul.f32 0.1, %v440_v20  ;;  %v443_v23 = vpop.f32.mrb[4].mxu1 }
 0x21e   :  { %v496_v25 = vmax.f32 %v438_v12, %v480_v22  ;;  %v444_v26 = vadd.f32 %v443_v23, %v1687_v34  ;;  %v445_v29 = vpop.f32.mrb[5].mxu1 }
 0x21f   :  { %v497_v31 = vmax.f32 %v440_v20, %v481_v7  ;;  %v446_v17 = vadd.f32 %v445_v29, %v1687_v34 }
 0x220   :  { %v1272_v32 = vpack.c.bf16 %v496_v25, %v494_v24  ;;  %v482_v13 = vmul.f32 0.1, %v444_v26 }
 0x221   :  { %v449_v33 = vpop.f32.mrb[6].mxu1  ;;  %v1270_v35 = vpack.c.bf16 %v497_v31, %v495_v30  ;;  %v483_v28 = vmul.f32 0.1, %v446_v17 }
 0x222   :  { %v450_v36 = vadd.f32 %v449_v33, %v1689_v44  ;;  %v451_v37 = vpop.f32.mrb[7].mxu1  ;;  %v498_v49 = vmax.f32 %v444_v26, %v482_v13 }
 0x223   :  { %v452_v38 = vadd.f32 %v451_v37, %v1689_v44  ;;  %1271 = vmatprep.subr.bf16.mxu1 %v1270_v35  ;;  %v499_v55 = vmax.f32 %v446_v17, %v483_v28  ;;  %v513_v28 = vld [vmem:[%s512_s28] sm:$0xff] }
 0x224   :  { %v484_v42 = vmul.f32 0.1, %v450_v36  ;;  %1273 = vmatpush1.bf16.msra.mxu1 %v1272_v32 }
 0x225   :  { %v485_v43 = vmul.f32 0.1, %v452_v38  ;;  %v455_v48 = vpop.f32.mrb[8].mxu1 }
 0x226   :  { %v500_v50 = vmax.f32 %v450_v36, %v484_v42  ;;  %v456_v52 = vadd.f32 %v455_v48, %v1691_v51  ;;  %v457_v34 = vpop.f32.mrb[9].mxu1  ;;  %v868_v42 = vpop.permute.xlu1 %867 }
 0x227   :  { %v501_v58 = vmax.f32 %v452_v38, %v485_v43  ;;  %v458_v1 = vadd.f32 %v457_v34, %v1691_v51 }
 0x228   :  { %v1276_v46 = vpack.c.bf16 %v500_v50, %v498_v49  ;;  %v486_v54 = vmul.f32 0.1, %v456_v52 }
 0x229   :  { %v461_v47 = vpop.f32.mrb[10].mxu1  ;;  %v1274_v53 = vpack.c.bf16 %v501_v58, %v499_v55  ;;  %v487_v8 = vmul.f32 0.1, %v458_v1 }
 0x22a   :  { %v462_v44 = vadd.f32 %v461_v47, %v1693_v2  ;;  %v463_v6 = vpop.f32.mrb[11].mxu1  ;;  %v502_v12 = vmax.f32 %v456_v52, %v486_v54 }
 0x22b   :  { %v464_v3 = vadd.f32 %v463_v6, %v1693_v2  ;;  %1275 = vmatprep.subr.bf16.mxu1 %v1274_v53  ;;  %v503_v20 = vmax.f32 %v458_v1, %v487_v8 }
 0x22c   :  { %v488_v9 = vmul.f32 0.1, %v462_v44  ;;  %1277 = vmatpush1.bf16.msra.mxu1 %v1276_v46 }
 0x22d   :  { %v489_v10 = vmul.f32 0.1, %v464_v3  ;;  %v467_v11 = vpop.f32.mrb[12].mxu1 }
 0x22e   :  { %v504_v15 = vmax.f32 %v462_v44, %v488_v9  ;;  %v468_v19 = vadd.f32 %v467_v11, %v1696_v63  ;;  %v469_v51 = vpop.f32.mrb[13].mxu1  ;;  %v878_v9 = vpop.permute.xlu1 %877 }
 0x22f   :  { %v505_v22 = vmax.f32 %v464_v3, %v489_v10  ;;  %v470_v7 = vadd.f32 %v469_v51, %v1696_v63 }
 0x230   :  { %v1280_v23 = vpack.c.bf16 %v504_v15, %v502_v12  ;;  %v490_v26 = vmul.f32 0.1, %v468_v19 }
 0x231   :  { %v473_v24 = vpop.f32.mrb[14].mxu1  ;;  %v1278_v25 = vpack.c.bf16 %v505_v22, %v503_v20  ;;  %v491_v30 = vmul.f32 0.1, %v470_v7 }
 0x232   :  { %v474_v2 = vadd.f32 %v473_v24, %v1700_v14  ;;  %v475_v29 = vpop.f32.mrb[15].mxu1  ;;  %v506_v33 = vmax.f32 %v468_v19, %v490_v26 }
 0x233   :  { %v476_v31 = vadd.f32 %v475_v29, %v1700_v14  ;;  %1279 = vmatprep.subr.bf16.mxu1 %v1278_v25  ;;  %v507_v13 = vmax.f32 %v470_v7, %v491_v30  ;;  %v863_v14 = vpop.permute.xlu0 %862 }
 0x234   :  { %v492_v17 = vmul.f32 0.1, %v474_v2  ;;  %1281 = vmatpush1.bf16.msra.mxu1 %v1280_v23 }
 0x235   :  { %v493_v32 = vmul.f32 0.1, %v476_v31 }
 0x236   :  { %v508_v35 = vmax.f32 %v474_v2, %v492_v17 }
 0x237   :  { %v509_v36 = vmax.f32 %v476_v31, %v493_v32  ;;  %v888_v32 = vpop.permute.xlu1 %887 }
 0x238   :  { %v1284_v63 = vpack.c.bf16 %v508_v35, %v506_v33 }
 0x239   :  { %v1282_v37 = vpack.c.bf16 %v509_v36, %v507_v13 }
 0x23b   :  { %1283 = vmatprep.subr.bf16.mxu1 %v1282_v37 }
 0x23c   :  { %1285 = vmatpush1.bf16.msra.mxu1 %v1284_v63 }
 0x23d   :  { %1319 = vmatprep.subr.bf16.mxu1 %v1718_v60 }
 0x23f   :  { %1207 = vmatmul.mubr.msk.f32.vlgmr.msra.gmra.mrb[16].mxu1 %vm340_vm0, %v513_v28 }
 0x240   :  { %1321 = vmatpush1.bf16.msra.mxu1 %v1710_v56  ;;  %988 = vmatprep.mubr.f32.mxu1 %v1427_v0 }
 0x241   :  { %1323 = vmatprep.subr.bf16.mxu1 %v1738_v21 }
 0x244   :  { %1325 = vmatpush1.bf16.msra.mxu1 %v1730_v16 }
 0x245   :  { %1327 = vmatprep.subr.bf16.mxu1 %v1758_v45 }
 0x248   :  { %1329 = vmatpush1.bf16.msra.mxu1 %v1750_v40 }
 0x249   :  { %1331 = vmatprep.subr.bf16.mxu1 %v1778_v5 }
 0x24c   :  { %1333 = vmatpush1.bf16.msra.mxu1 %v1770_v61 }
 0x24f   :  { %1209 = vmatmul.mubr.msk.f32.vlgmr.msra.gmra.mrb[18].mxu1 %vm340_vm0, %v1706_v39  ;;  %v873_v39 = vpop.permute.xlu0 %872 }
 0x250   :  { %994 = vmatprep.mubr.f32.mxu1 %v1427_v0 }
 0x253   :  { %1210 = vmatmul.mubr.msk.f32.gmra.mrb[20].mxu1 %vm340_vm0, %v1716_v57  ;;  %v883_v56 = vpop.permute.xlu0 %882 }
 0x254   :  { %1000 = vmatprep.mubr.f32.mxu1 %v1427_v0 }
 0x257   :  { %1211 = vmatmul.mubr.msk.f32.gmra.mrb[22].mxu1 %vm340_vm0, %v1726_v62  ;;  %v1837_v57 = vpop.permute.xlu0 %892 }
 0x258   :  { %1006 = vmatprep.mubr.f32.mxu1 %v1427_v0 }
 0x25b   :  { %1212 = vmatmul.mubr.msk.f32.gmra.mrb[24].mxu1 %vm340_vm0, %v1736_v18  ;;  %v519_v60 = vpop.permute.xlu0 %518 }
 0x25c   :  { %1012 = vmatprep.mubr.f32.mxu1 %v1427_v0 }
 0x25f   :  { %1213 = vmatmul.mubr.msk.f32.gmra.mrb[26].mxu1 %vm340_vm0, %v1746_v27 }
 0x260   :  { %1018 = vmatprep.mubr.f32.mxu1 %v1427_v0 }
 0x263   :  { %1214 = vmatmul.mubr.msk.f32.gmra.mrb[28].mxu1 %vm340_vm0, %v1756_v41 }
 0x264   :  { %1024 = vmatprep.mubr.f32.mxu1 %v1427_v0 }
 0x267   :  { %1215 = vmatmul.mubr.msk.f32.gmra.mrb[30].mxu1 %vm340_vm0, %v1766_v59 }
 0x268   :  { %1030 = vmatprep.mubr.f32.mxu1 %v1427_v0 }
 0x26b   :  { %1216 = vmatmul.mubr.msk.f32.gmra.mrb[32].mxu1 %vm340_vm0, %v1776_v4 }
 0x312   :  { %v590_v62 = vpop.f32.mrb[16].mxu1 }
 0x313   :  { %v591_v16 = vadd.f32 %v590_v62, %v519_v60  ;;  %v592_v18 = vpop.f32.mrb[17].mxu1 }
 0x314   :  { %v593_v21 = vadd.f32 %v592_v18, %v519_v60 }
 0x316   :  { %v597_v27 = vcombine.low %v591_v16, %v593_v21  ;;  %v600_v40 = vcombine.high %v591_v16, %v593_v21 }
 0x318   :  { %599 = vst [vmem:[%s1881_s8] sm:$0x77] %v597_v27  ;;  %v1208_v0 = vrot.slane %v597_v27, 11  ;;  %v606_v45 = vrot.slane %v600_v40, 7 }
 0x31a   :  { %v607_v59 = vsel %vm1839_vm3, %v1208_v0, %v606_v45  ;;  %v898_v45 = vpop.permute.xlu1 %897 }
 0x31b   :  { %609 = vst [vmem:[#allocation7] sm:$0xff] %v607_v59 }
 0x322   :  { %v990_v61 = vpop.f32.mrb[18].mxu1 }
 0x323   :  { %v991_v4 = vadd.f32 %v990_v61, %v863_v14  ;;  %v992_v5 = vpop.f32.mrb[19].mxu1 }
 0x324   :  { %v993_v38 = vadd.f32 %v992_v5, %v863_v14 }
 0x325   :  { %v1037_v48 = vmul.f32 0.1, %v991_v4 }
 0x326   :  { %v996_v43 = vpop.f32.mrb[20].mxu1  ;;  %v1038_v52 = vmul.f32 0.1, %v993_v38 }
 0x327   :  { %v997_v49 = vadd.f32 %v996_v43, %v868_v42  ;;  %v998_v50 = vpop.f32.mrb[21].mxu1  ;;  %v1053_v46 = vmax.f32 %v991_v4, %v1037_v48 }
 0x328   :  { %v999_v34 = vadd.f32 %v998_v50, %v868_v42  ;;  %v1054_v44 = vmax.f32 %v993_v38, %v1038_v52 }
 0x329   :  { %v1039_v55 = vmul.f32 0.1, %v997_v49 }
 0x32a   :  { %v1040_v58 = vmul.f32 0.1, %v999_v34  ;;  %v1002_v1 = vpop.f32.mrb[22].mxu1 }
 0x32b   :  { %v1055_v47 = vmax.f32 %v997_v49, %v1039_v55  ;;  %v1003_v53 = vadd.f32 %v1002_v1, %v873_v39  ;;  %v1004_v54 = vpop.f32.mrb[23].mxu1  ;;  %v1073_v1 = vld [vmem:[%s1072_s10] sm:$0xff] }
 0x32c   :  { %v1056_v6 = vmax.f32 %v999_v34, %v1040_v58  ;;  %v1005_v8 = vadd.f32 %v1004_v54, %v873_v39 }
 0x32d   :  { %v1336_v3 = vpack.c.bf16 %v1055_v47, %v1053_v46  ;;  %v1041_v12 = vmul.f32 0.1, %v1003_v53  ;;  %v1079_v46 = vpop.permute.xlu1 %1078 }
 0x32e   :  { %v1008_v10 = vpop.f32.mrb[24].mxu1  ;;  %v1334_v11 = vpack.c.bf16 %v1056_v6, %v1054_v44  ;;  %v1042_v51 = vmul.f32 0.1, %v1005_v8 }
 0x32f   :  { %v1009_v15 = vadd.f32 %v1008_v10, %v878_v9  ;;  %v1010_v19 = vpop.f32.mrb[25].mxu1  ;;  %v1057_v24 = vmax.f32 %v1003_v53, %v1041_v12 }
 0x330   :  { %v1011_v20 = vadd.f32 %v1010_v19, %v878_v9  ;;  %1335 = vmatprep.subr.bf16.mxu0 %v1334_v11  ;;  %v1058_v29 = vmax.f32 %v1005_v8, %v1042_v51 }
 0x331   :  { %v1043_v22 = vmul.f32 0.1, %v1009_v15  ;;  %1337 = vmatpush1.bf16.msra.mxu0 %v1336_v3 }
 0x332   :  { %v1044_v7 = vmul.f32 0.1, %v1011_v20  ;;  %v1014_v23 = vpop.f32.mrb[26].mxu1 }
 0x333   :  { %v1059_v25 = vmax.f32 %v1009_v15, %v1043_v22  ;;  %v1015_v26 = vadd.f32 %v1014_v23, %v883_v56  ;;  %v1016_v2 = vpop.f32.mrb[27].mxu1 }
 0x334   :  { %v1060_v30 = vmax.f32 %v1011_v20, %v1044_v7  ;;  %v1017_v31 = vadd.f32 %v1016_v2, %v883_v56 }
 0x335   :  { %v1340_v17 = vpack.c.bf16 %v1059_v25, %v1057_v24  ;;  %v1045_v13 = vmul.f32 0.1, %v1015_v26 }
 0x336   :  { %v1020_v33 = vpop.f32.mrb[28].mxu1  ;;  %v1338_v35 = vpack.c.bf16 %v1060_v30, %v1058_v29  ;;  %v1046_v37 = vmul.f32 0.1, %v1017_v31 }
 0x337   :  { %v1021_v36 = vadd.f32 %v1020_v33, %v888_v32  ;;  %v1022_v63 = vpop.f32.mrb[29].mxu1  ;;  %v1061_v62 = vmax.f32 %v1015_v26, %v1045_v13 }
 0x338   :  { %v1023_v28 = vadd.f32 %v1022_v63, %v888_v32  ;;  %1339 = vmatprep.subr.bf16.mxu0 %v1338_v35  ;;  %v1062_v56 = vmax.f32 %v1017_v31, %v1046_v37 }
 0x339   :  { %v1047_v14 = vmul.f32 0.1, %v1021_v36  ;;  %1341 = vmatpush1.bf16.msra.mxu0 %v1340_v17 }
 0x33a   :  { %v1048_v39 = vmul.f32 0.1, %v1023_v28  ;;  %v1026_v60 = vpop.f32.mrb[30].mxu1 }
 0x33b   :  { %v1063_v16 = vmax.f32 %v1021_v36, %v1047_v14  ;;  %v1027_v18 = vadd.f32 %v1026_v60, %v1837_v57  ;;  %v1028_v21 = vpop.f32.mrb[31].mxu1 }
 0x33c   :  { %v1064_v27 = vmax.f32 %v1023_v28, %v1048_v39  ;;  %v1029_v40 = vadd.f32 %v1028_v21, %v1837_v57 }
 0x33d   :  { %v1344_v0 = vpack.c.bf16 %v1063_v16, %v1061_v62  ;;  %v1049_v4 = vmul.f32 0.1, %v1027_v18 }
 0x33e   :  { %v1032_v59 = vpop.f32.mrb[32].mxu1  ;;  %v1342_v61 = vpack.c.bf16 %v1064_v27, %v1062_v56  ;;  %v1050_v42 = vmul.f32 0.1, %v1029_v40 }
 0x33f   :  { %v1033_v5 = vadd.f32 %v1032_v59, %v898_v45  ;;  %v1034_v38 = vpop.f32.mrb[33].mxu1  ;;  %v1065_v50 = vmax.f32 %v1027_v18, %v1049_v4 }
 0x340   :  { %v1035_v43 = vadd.f32 %v1034_v38, %v898_v45  ;;  %1343 = vmatprep.subr.bf16.mxu0 %v1342_v61  ;;  %v1066_v34 = vmax.f32 %v1029_v40, %v1050_v42 }
 0x341   :  { %v1051_v48 = vmul.f32 0.1, %v1033_v5  ;;  %1345 = vmatpush1.bf16.msra.mxu0 %v1344_v0 }
 0x342   :  { %v1052_v49 = vmul.f32 0.1, %v1035_v43 }
 0x343   :  { %v1067_v52 = vmax.f32 %v1033_v5, %v1051_v48 }
 0x344   :  { %v1068_v55 = vmax.f32 %v1035_v43, %v1052_v49 }
 0x345   :  { %v1348_v58 = vpack.c.bf16 %v1067_v52, %v1065_v50 }
 0x346   :  { %v1346_v57 = vpack.c.bf16 %v1068_v55, %v1066_v34 }
 0x348   :  { %1347 = vmatprep.subr.bf16.mxu0 %v1346_v57 }
 0x349   :  { %1349 = vmatpush1.bf16.msra.mxu0 %v1348_v58 }
 0x34c   :  { %1219 = vmatmul.mubr.msk.f32.vlgmr.msra.gmra.mrb[32].mxu0 %vm340_vm0, %v1073_v1 }
 0x41f   :  { %v1150_v47 = vpop.f32.mrb[32].mxu0 }
 0x420   :  { %v1151_v53 = vadd.f32 %v1150_v47, %v1079_v46  ;;  %v1152_v54 = vpop.f32.mrb[33].mxu0 }
 0x421   :  { %v1153_v44 = vadd.f32 %v1152_v54, %v1079_v46 }
 0x423   :  { %v1157_v6 = vcombine.low %v1151_v53, %v1153_v44  ;;  %v1161_v8 = vcombine.high %v1151_v53, %v1153_v44 }
 0x425   :  { %1220 = vst [vmem:[%s1881_s8 + $0x8] sm:$0x77] %v1157_v6  ;;  %v1221_v3 = vrot.slane %v1157_v6, 11  ;;  %v1164_v9 = vrot.slane %v1161_v8, 7 }
 0x427   :  { %v1165_v10 = vsel %vm1839_vm3, %v1221_v3, %v1164_v9 }
 0x428   :  { %1168 = vst [vmem:[#allocation7 + $0x8] sm:$0xff] %v1165_v10 }
 0x429   :  { %1406 = shalt.err (!%p1403_p3)
}
 0x42a   :  { %s1407_s14 = scalar_lea.hbm %s1882_s9, 256 }
 0x42b   :  { %p1408_p4 = scmp.ne.s32.totalorder %s1882_s9, %s1407_s14  ;;  %p1411_p5 = scmp.lt.u32.totalorder %s1407_s14, %s1882_s9 }
 0x42d   :  { %p1413_p6 = pnand %p1411_p5, %p1408_p4 }
 0x42f   :  { %1416 = shalt.err (!%p1413_p6)
}
 0x430   :  { %s1430_s17 = smov 128   ;;  %s1431_s18 = smov 8  }
 0x431   :  { %1182 = dma.vmem_to_hbm [thread:$0]  %s1177_s12, 256, %s1882_s9, [#allocation6], %s1430_s17, %s1430_s17, %s1431_s18  }
 0x432   :  { %1421 = dma.done.wait [#allocation6], 256  }
 0x433   :  { %1422 = vsyncadd [#allocation6], 4294967040 }
 0x434   :  { %1188 = vsyncpa [#allocation5], 1 }
 0x435   :  { %1189 = vsyncpa [#allocation6], 1 }

</bundles_post_ra>
